<compile_context>
chip_gen: v5e
topology: v5e:2x2
jax: 0.10.0
libtpu: 0.0.40
codegen_flags: <defaults>
</compile_context>

<pallas_src>
import functools

import jax
import jax.numpy as jnp
import numpy as np
from jax.experimental import pallas as pl
from jax.experimental.pallas import tpu as pltpu


def _sepconv_kernel(x_ref, wdw_ref, bdw_ref, sel_ref, selt_ref, m0_ref, bpw_ref,
                    o_ref, xp_ref, *, K, S, P, H, W, H_out, W_out, C_mid, C_out,
                    eps):
    # x_ref:    (H, W*C_mid)               one batch element, channels fastest
    # wdw_ref:  (K*K, Wf*C_mid)            depthwise weights, tiled across W
    # bdw_ref:  (1, Wf*C_mid)              depthwise bias, tiled across W
    # sel_ref:  (W_out*C_mid, C_mid)       static lane-group -> channel selector
    # selt_ref: (C_mid, W_out*C_mid)       its transpose (channel -> lane groups)
    # m0_ref:   (W_out*C_mid, W_out*C_out) block-diagonal pointwise weights
    # bpw_ref:  (1, W_out*C_out)           pointwise bias, tiled across W
    # o_ref:    (H_out, W_out*C_out)       lane-dense output block
    # xp_ref:   (Hp, Wp*C_mid) f32         VMEM scratch: zero-padded input
    C = C_mid
    Hp, Wp = H + 2 * P, W + 2 * P
    Hf, Wf = Hp - K + 1, Wp - K + 1          # stride-1 depthwise output extent

    # ---- zero-pad inside the kernel: interior store into the VMEM scratch ----
    if P > 0:
        xp_ref[...] = jnp.zeros(xp_ref.shape, xp_ref.dtype)
    xp_ref[pl.ds(P, H), pl.ds(P * C, W * C)] = x_ref[...].astype(xp_ref.dtype)

    # ---- depthwise KxK conv (groups == channels), flattened (H, W*C) layout ----
    acc = jnp.zeros((Hf, Wf * C), jnp.float32)
    for kh in range(K):
        for kw in range(K):
            patch = xp_ref[pl.ds(kh, Hf), pl.ds(kw * C, Wf * C)]
            w_row = wdw_ref[pl.ds(kh * K + kw, 1), :].astype(jnp.float32)
            acc = acc + patch * w_row
    acc = acc + bdw_ref[...].astype(jnp.float32)

    if S > 1:
        # TODO(synk): stride>1 runs the depthwise at stride 1 and subsamples via
        # a reshape (relayout); correct but untuned. The tested/default path is S==1.
        a3 = acc.reshape(Hf, Wf, C)
        a3 = jax.lax.slice(a3, (0, 0, 0),
                           ((H_out - 1) * S + 1, (W_out - 1) * S + 1, C),
                           (S, S, 1))
        acc = a3.reshape(H_out, W_out * C)

    # ---- InstanceNorm2d (affine=False, biased variance, eps) -----------------
    # Per-channel sums via tiny static selector matmuls (no relayout reshapes).
    n = float(H_out * W_out)
    sel = sel_ref[...].astype(jnp.float32)                 # (W_out*C, C)
    col_sum = jnp.sum(acc, axis=0, keepdims=True)          # (1, W_out*C)
    col_sq = jnp.sum(acc * acc, axis=0, keepdims=True)     # (1, W_out*C)
    ch_sum = jnp.dot(col_sum, sel, preferred_element_type=jnp.float32)   # (1, C)
    ch_sq = jnp.dot(col_sq, sel, preferred_element_type=jnp.float32)     # (1, C)
    mean = ch_sum / n
    var = ch_sq / n - mean * mean
    inv_std = jax.lax.rsqrt(var + eps)                     # (1, C)

    selt = selt_ref[...].astype(jnp.float32)               # (C, W_out*C)
    mean_row = jnp.dot(mean, selt, preferred_element_type=jnp.float32)     # (1, W_out*C)
    istd_row = jnp.dot(inv_std, selt, preferred_element_type=jnp.float32)  # (1, W_out*C)
    normed = (acc - mean_row) * istd_row                   # (H_out, W_out*C)

    # ---- pointwise 1x1 conv: one lane-dense matmul against the block-diagonal
    #      expansion of the (C_mid, C_out) weights; output is (H_out, W*C_out).
    out = jnp.dot(normed, m0_ref[...].astype(jnp.float32),
                  preferred_element_type=jnp.float32)
    out = out + bpw_ref[...].astype(jnp.float32)
    o_ref[...] = out.astype(o_ref.dtype)


def separable_conv2d(x_nchw, wdw, bdw, wpw, bpw, *, stride=1, padding=0,
                     scale_factor=1, eps=1e-5):
    """Fused depthwise KxK conv -> InstanceNorm2d -> 1x1 conv.

    x_nchw: (B, C_in, H, W)
    wdw:    (C_mid, 1, K, K)   depthwise weights (PyTorch OIHW, groups=C_in)
    bdw:    (C_mid,)
    wpw:    (C_out, C_mid, 1, 1)
    bpw:    (C_out,)
    Returns NCHW (B, C_out, H_out, W_out).
    """
    B, C_in, H, W = x_nchw.shape
    C_mid = C_in * scale_factor
    C_out = wpw.shape[0]
    K = wdw.shape[-1]
    S, P = stride, padding
    H_out = (H + 2 * P - K) // S + 1
    W_out = (W + 2 * P - K) // S + 1
    Hp, Wp = H + 2 * P, W + 2 * P
    Hf, Wf = Hp - K + 1, Wp - K + 1

    # ---- input: NCHW -> (B, H, W*C_mid), channels fastest on the lane axis ----
    x = jnp.transpose(x_nchw, (0, 2, 3, 1))                 # NHWC
    if scale_factor > 1:
        # grouped depthwise output channel j reads input channel j // scale_factor
        x = jnp.repeat(x, scale_factor, axis=-1)
    x_flat = x.reshape(B, H, W * C_mid)

    # ---- tiny wrapper-side operand prep (tiled weights + static selectors) ----
    f32 = jnp.float32
    wdw_mat = jnp.transpose(wdw[:, 0].reshape(C_mid, K * K)).astype(f32)   # (K*K, C_mid)
    wdw_t = jnp.tile(wdw_mat, (1, Wf))                                     # (K*K, Wf*C_mid)
    bdw_t = jnp.tile(bdw.reshape(1, C_mid).astype(f32), (1, Wf))           # (1, Wf*C_mid)
    sel = jnp.tile(jnp.eye(C_mid, dtype=f32), (W_out, 1))                  # (W_out*C_mid, C_mid)
    selt = jnp.transpose(sel)                                              # (C_mid, W_out*C_mid)
    wpw_mat = jnp.transpose(wpw[:, :, 0, 0]).astype(f32)                   # (C_mid, C_out)
    m0 = jnp.kron(jnp.eye(W_out, dtype=f32), wpw_mat)                      # (W_out*C_mid, W_out*C_out)
    bpw_t = jnp.tile(bpw.reshape(1, C_out).astype(f32), (1, W_out))        # (1, W_out*C_out)

    kernel = functools.partial(
        _sepconv_kernel, K=K, S=S, P=P, H=H, W=W, H_out=H_out, W_out=W_out,
        C_mid=C_mid, C_out=C_out, eps=eps)

    out_flat = pl.pallas_call(
        kernel,
        out_shape=jax.ShapeDtypeStruct((B, H_out, W_out * C_out), x_nchw.dtype),
        grid=(B,),
        in_specs=[
            pl.BlockSpec((None, H, W * C_mid), lambda b: (b, 0, 0)),
            pl.BlockSpec((K * K, Wf * C_mid), lambda b: (0, 0)),
            pl.BlockSpec((1, Wf * C_mid), lambda b: (0, 0)),
            pl.BlockSpec((W_out * C_mid, C_mid), lambda b: (0, 0)),
            pl.BlockSpec((C_mid, W_out * C_mid), lambda b: (0, 0)),
            pl.BlockSpec((W_out * C_mid, W_out * C_out), lambda b: (0, 0)),
            pl.BlockSpec((1, W_out * C_out), lambda b: (0, 0)),
        ],
        out_specs=pl.BlockSpec((None, H_out, W_out * C_out),
                               lambda b: (b, 0, 0)),
        scratch_shapes=[pltpu.VMEM((Hp, Wp * C_mid), jnp.float32)],
        compiler_params=pltpu.CompilerParams(
            dimension_semantics=("parallel",)),
    )(x_flat, wdw_t, bdw_t, sel, selt, m0, bpw_t)

    # (B, H_out, W_out*C_out) -> NCHW (output is small; this is one cheap pass)
    out = out_flat.reshape(B, H_out, W_out, C_out)
    return jnp.transpose(out, (0, 3, 1, 2))


def _reference_forward(x, wdw, bdw, wpw, bpw, *, stride, padding, groups, eps=1e-5):
    dw = jax.lax.conv_general_dilated(
        x, wdw, (stride, stride), [(padding, padding), (padding, padding)],
        dimension_numbers=("NCHW", "OIHW", "NCHW"), feature_group_count=groups)
    dw = dw + bdw[None, :, None, None]
    mean = dw.mean(axis=(2, 3), keepdims=True)
    var = ((dw - mean) ** 2).mean(axis=(2, 3), keepdims=True)
    nrm = (dw - mean) / jnp.sqrt(var + eps)
    pw = jax.lax.conv_general_dilated(
        nrm, wpw, (1, 1), [(0, 0), (0, 0)],
        dimension_numbers=("NCHW", "OIHW", "NCHW"))
    return pw + bpw[None, :, None, None]


if __name__ == "__main__":
    key = jax.random.PRNGKey(0)

    # Test 1: SeparableConv2d(in=4, out=8, k=3, stride=1, padding=1, scale_factor=1)
    B, C_IN, H, W = 2, 4, 16, 16
    K, STRIDE, PAD, SCALE = 3, 1, 1, 1
    C_MID = C_IN * SCALE
    C_OUT = 8
    kx, k1, k2, k3, k4, key = jax.random.split(key, 6)
    x = jax.random.normal(kx, (B, C_IN, H, W), jnp.float32)
    wdw = 0.1 * jax.random.normal(k1, (C_MID, 1, K, K), jnp.float32)
    bdw = 0.1 * jax.random.normal(k2, (C_MID,), jnp.float32)
    wpw = 0.1 * jax.random.normal(k3, (C_OUT, C_MID, 1, 1), jnp.float32)
    bpw = 0.1 * jax.random.normal(k4, (C_OUT,), jnp.float32)

    out = separable_conv2d(x, wdw, bdw, wpw, bpw,
                           stride=STRIDE, padding=PAD, scale_factor=SCALE)
    out = jax.block_until_ready(out)
    ref = _reference_forward(x, wdw, bdw, wpw, bpw,
                             stride=STRIDE, padding=PAD, groups=C_IN)
    np.testing.assert_allclose(np.asarray(out), np.asarray(ref),
                               rtol=1e-4, atol=1e-4)

    # Test 2: scale_factor=2 path (grouped channel expansion), same spatial size.
    SCALE2 = 2
    C_MID2 = C_IN * SCALE2
    k5, k6, k7, k8, key = jax.random.split(key, 5)
    wdw2 = 0.1 * jax.random.normal(k5, (C_MID2, 1, K, K), jnp.float32)
    bdw2 = 0.1 * jax.random.normal(k6, (C_MID2,), jnp.float32)
    wpw2 = 0.1 * jax.random.normal(k7, (C_OUT, C_MID2, 1, 1), jnp.float32)
    bpw2 = 0.1 * jax.random.normal(k8, (C_OUT,), jnp.float32)

    out2 = separable_conv2d(x, wdw2, bdw2, wpw2, bpw2,
                            stride=STRIDE, padding=PAD, scale_factor=SCALE2)
    out2 = jax.block_until_ready(out2)
    ref2 = _reference_forward(x, wdw2, bdw2, wpw2, bpw2,
                              stride=STRIDE, padding=PAD, groups=C_IN)
    np.testing.assert_allclose(np.asarray(out2), np.asarray(ref2),
                               rtol=1e-4, atol=1e-4)

    print("KERNEL_OK")
</pallas_src>

<mosaic_0001>
module attributes {stable_mosaic.version = 11 : i64} {
  func.func @_sepconv_kernel(%arg0: i32, %arg1: memref<1x16x64xf32, #tpu.memory_space<vmem>>, %arg2: memref<9x64xf32, #tpu.memory_space<vmem>>, %arg3: memref<1x64xf32, #tpu.memory_space<vmem>>, %arg4: memref<64x4xf32, #tpu.memory_space<vmem>>, %arg5: memref<4x64xf32, #tpu.memory_space<vmem>>, %arg6: memref<64x128xf32, #tpu.memory_space<vmem>>, %arg7: memref<1x128xf32, #tpu.memory_space<vmem>>, %arg8: memref<1x16x128xf32, #tpu.memory_space<vmem>>, %arg9: memref<18x72xf32, #tpu.memory_space<vmem>>) attributes {dimension_semantics = [#tpu.dimension_semantics<parallel>], iteration_bounds = array<i64: 2>, scalar_prefetch = 0 : i64, scratch_operands = 1 : i64, tpu.core_type = #tpu.core_type<tc>, window_params = [{transform_indices = @transform_0, window_bounds = array<i64: 1, 16, 64>}, {pipeline_mode = #tpu.pipeline_mode<synchronous>, transform_indices = @transform_1, window_bounds = array<i64: 9, 64>}, {pipeline_mode = #tpu.pipeline_mode<synchronous>, transform_indices = @transform_2, window_bounds = array<i64: 1, 64>}, {pipeline_mode = #tpu.pipeline_mode<synchronous>, transform_indices = @transform_3, window_bounds = array<i64: 64, 4>}, {pipeline_mode = #tpu.pipeline_mode<synchronous>, transform_indices = @transform_4, window_bounds = array<i64: 4, 64>}, {pipeline_mode = #tpu.pipeline_mode<synchronous>, transform_indices = @transform_5, window_bounds = array<i64: 64, 128>}, {pipeline_mode = #tpu.pipeline_mode<synchronous>, transform_indices = @transform_6, window_bounds = array<i64: 1, 128>}, {transform_indices = @transform_7, window_bounds = array<i64: 1, 16, 128>}]} {
    %cst = arith.constant 0.000000e+00 : f32
    %0 = vector.broadcast %cst : f32 to vector<18x72xf32>
    %c0 = arith.constant 0 : index
    %c0_0 = arith.constant 0 : index
    %1 = vector.load %arg9[%c0, %c0_0] : memref<18x72xf32, #tpu.memory_space<vmem>>, vector<18x72xf32>
    tpu.vector_store %arg9[%c0, %c0_0], %0 {strides = array<i32>} : memref<18x72xf32, #tpu.memory_space<vmem>>, vector<18x72xf32>,
    %c0_1 = arith.constant 0 : index
    %c0_2 = arith.constant 0 : index
    %c0_3 = arith.constant 0 : index
    %2 = vector.load %arg1[%c0_1, %c0_2, %c0_3] : memref<1x16x64xf32, #tpu.memory_space<vmem>>, vector<1x16x64xf32>
    %3 = vector.shape_cast %2 : vector<1x16x64xf32> to vector<16x64xf32>
    %c1 = arith.constant 1 : index
    %c4 = arith.constant 4 : index
    %4 = vector.load %arg9[%c1, %c4] : memref<18x72xf32, #tpu.memory_space<vmem>>, vector<16x64xf32>
    tpu.vector_store %arg9[%c1, %c4], %3 {strides = array<i32>} : memref<18x72xf32, #tpu.memory_space<vmem>>, vector<16x64xf32>,
    %cst_4 = arith.constant 0.000000e+00 : f32
    %5 = vector.broadcast %cst_4 : f32 to vector<16x64xf32>
    %c0_5 = arith.constant 0 : index
    %c0_6 = arith.constant 0 : index
    %6 = vector.load %arg9[%c0_5, %c0_6] : memref<18x72xf32, #tpu.memory_space<vmem>>, vector<16x64xf32>
    %c0_7 = arith.constant 0 : index
    %c0_8 = arith.constant 0 : index
    %7 = vector.load %arg2[%c0_7, %c0_8] : memref<9x64xf32, #tpu.memory_space<vmem>>, vector<1x64xf32>
    %8 = vector.broadcast %7 : vector<1x64xf32> to vector<16x64xf32>
    %9 = arith.mulf %6, %8 : vector<16x64xf32>
    %10 = arith.addf %5, %9 : vector<16x64xf32>
    %c0_9 = arith.constant 0 : index
    %c4_10 = arith.constant 4 : index
    %11 = vector.load %arg9[%c0_9, %c4_10] : memref<18x72xf32, #tpu.memory_space<vmem>>, vector<16x64xf32>
    %c1_11 = arith.constant 1 : index
    %c0_12 = arith.constant 0 : index
    %12 = vector.load %arg2[%c1_11, %c0_12] : memref<9x64xf32, #tpu.memory_space<vmem>>, vector<1x64xf32>
    %13 = vector.broadcast %12 : vector<1x64xf32> to vector<16x64xf32>
    %14 = arith.mulf %11, %13 : vector<16x64xf32>
    %15 = arith.addf %10, %14 : vector<16x64xf32>
    %c0_13 = arith.constant 0 : index
    %c8 = arith.constant 8 : index
    %16 = vector.load %arg9[%c0_13, %c8] : memref<18x72xf32, #tpu.memory_space<vmem>>, vector<16x64xf32>
    %c2 = arith.constant 2 : index
    %c0_14 = arith.constant 0 : index
    %17 = vector.load %arg2[%c2, %c0_14] : memref<9x64xf32, #tpu.memory_space<vmem>>, vector<1x64xf32>
    %18 = vector.broadcast %17 : vector<1x64xf32> to vector<16x64xf32>
    %19 = arith.mulf %16, %18 : vector<16x64xf32>
    %20 = arith.addf %15, %19 : vector<16x64xf32>
    %c1_15 = arith.constant 1 : index
    %c0_16 = arith.constant 0 : index
    %21 = vector.load %arg9[%c1_15, %c0_16] : memref<18x72xf32, #tpu.memory_space<vmem>>, vector<16x64xf32>
    %c3 = arith.constant 3 : index
    %c0_17 = arith.constant 0 : index
    %22 = vector.load %arg2[%c3, %c0_17] : memref<9x64xf32, #tpu.memory_space<vmem>>, vector<1x64xf32>
    %23 = vector.broadcast %22 : vector<1x64xf32> to vector<16x64xf32>
    %24 = arith.mulf %21, %23 : vector<16x64xf32>
    %25 = arith.addf %20, %24 : vector<16x64xf32>
    %c1_18 = arith.constant 1 : index
    %c4_19 = arith.constant 4 : index
    %26 = vector.load %arg9[%c1_18, %c4_19] : memref<18x72xf32, #tpu.memory_space<vmem>>, vector<16x64xf32>
    %c4_20 = arith.constant 4 : index
    %c0_21 = arith.constant 0 : index
    %27 = vector.load %arg2[%c4_20, %c0_21] : memref<9x64xf32, #tpu.memory_space<vmem>>, vector<1x64xf32>
    %28 = vector.broadcast %27 : vector<1x64xf32> to vector<16x64xf32>
    %29 = arith.mulf %26, %28 : vector<16x64xf32>
    %30 = arith.addf %25, %29 : vector<16x64xf32>
    %c1_22 = arith.constant 1 : index
    %c8_23 = arith.constant 8 : index
    %31 = vector.load %arg9[%c1_22, %c8_23] : memref<18x72xf32, #tpu.memory_space<vmem>>, vector<16x64xf32>
    %c5 = arith.constant 5 : index
    %c0_24 = arith.constant 0 : index
    %32 = vector.load %arg2[%c5, %c0_24] : memref<9x64xf32, #tpu.memory_space<vmem>>, vector<1x64xf32>
    %33 = vector.broadcast %32 : vector<1x64xf32> to vector<16x64xf32>
    %34 = arith.mulf %31, %33 : vector<16x64xf32>
    %35 = arith.addf %30, %34 : vector<16x64xf32>
    %c2_25 = arith.constant 2 : index
    %c0_26 = arith.constant 0 : index
    %36 = vector.load %arg9[%c2_25, %c0_26] : memref<18x72xf32, #tpu.memory_space<vmem>>, vector<16x64xf32>
    %c6 = arith.constant 6 : index
    %c0_27 = arith.constant 0 : index
    %37 = vector.load %arg2[%c6, %c0_27] : memref<9x64xf32, #tpu.memory_space<vmem>>, vector<1x64xf32>
    %38 = vector.broadcast %37 : vector<1x64xf32> to vector<16x64xf32>
    %39 = arith.mulf %36, %38 : vector<16x64xf32>
    %40 = arith.addf %35, %39 : vector<16x64xf32>
    %c2_28 = arith.constant 2 : index
    %c4_29 = arith.constant 4 : index
    %41 = vector.load %arg9[%c2_28, %c4_29] : memref<18x72xf32, #tpu.memory_space<vmem>>, vector<16x64xf32>
    %c7 = arith.constant 7 : index
    %c0_30 = arith.constant 0 : index
    %42 = vector.load %arg2[%c7, %c0_30] : memref<9x64xf32, #tpu.memory_space<vmem>>, vector<1x64xf32>
    %43 = vector.broadcast %42 : vector<1x64xf32> to vector<16x64xf32>
    %44 = arith.mulf %41, %43 : vector<16x64xf32>
    %45 = arith.addf %40, %44 : vector<16x64xf32>
    %c2_31 = arith.constant 2 : index
    %c8_32 = arith.constant 8 : index
    %46 = vector.load %arg9[%c2_31, %c8_32] : memref<18x72xf32, #tpu.memory_space<vmem>>, vector<16x64xf32>
    %c8_33 = arith.constant 8 : index
    %c0_34 = arith.constant 0 : index
    %47 = vector.load %arg2[%c8_33, %c0_34] : memref<9x64xf32, #tpu.memory_space<vmem>>, vector<1x64xf32>
    %48 = vector.broadcast %47 : vector<1x64xf32> to vector<16x64xf32>
    %49 = arith.mulf %46, %48 : vector<16x64xf32>
    %50 = arith.addf %45, %49 : vector<16x64xf32>
    %c0_35 = arith.constant 0 : index
    %c0_36 = arith.constant 0 : index
    %51 = vector.load %arg3[%c0_35, %c0_36] : memref<1x64xf32, #tpu.memory_space<vmem>>, vector<1x64xf32>
    %52 = vector.broadcast %51 : vector<1x64xf32> to vector<16x64xf32>
    %53 = arith.addf %50, %52 : vector<16x64xf32>
    %c0_37 = arith.constant 0 : index
    %c0_38 = arith.constant 0 : index
    %54 = vector.load %arg4[%c0_37, %c0_38] : memref<64x4xf32, #tpu.memory_space<vmem>>, vector<64x4xf32>
    %cst_39 = arith.constant dense<0.000000e+00> : vector<64xf32>
    %55 = vector.multi_reduction <add>, %53, %cst_39 [0] : vector<16x64xf32> to vector<64xf32>
    %56 = vector.shape_cast %55 : vector<64xf32> to vector<1x64xf32>
    %57 = arith.mulf %53, %53 : vector<16x64xf32>
    %cst_40 = arith.constant dense<0.000000e+00> : vector<64xf32>
    %58 = vector.multi_reduction <add>, %57, %cst_40 [0] : vector<16x64xf32> to vector<64xf32>
    %59 = vector.shape_cast %58 : vector<64xf32> to vector<1x64xf32>
    %cst_41 = arith.constant dense<0.000000e+00> : vector<1x4xf32>
    %60 = tpu.matmul %56, %54, %cst_41 {dimension_numbers = #tpu.dot_dimension_numbers<[1], [0], [0], [1], [0, 0, 1, 1], [], []>} : vector<1x64xf32>, vector<64x4xf32>, vector<1x4xf32> -> vector<1x4xf32>
    %cst_42 = arith.constant dense<0.000000e+00> : vector<1x4xf32>
    %61 = tpu.matmul %59, %54, %cst_42 {dimension_numbers = #tpu.dot_dimension_numbers<[1], [0], [0], [1], [0, 0, 1, 1], [], []>} : vector<1x64xf32>, vector<64x4xf32>, vector<1x4xf32> -> vector<1x4xf32>
    %cst_43 = arith.constant 2.560000e+02 : f32
    %62 = vector.broadcast %cst_43 : f32 to vector<1x4xf32>
    %63 = arith.divf %60, %62 : vector<1x4xf32>
    %cst_44 = arith.constant 2.560000e+02 : f32
    %64 = vector.broadcast %cst_44 : f32 to vector<1x4xf32>
    %65 = arith.divf %61, %64 : vector<1x4xf32>
    %66 = arith.mulf %63, %63 : vector<1x4xf32>
    %67 = arith.subf %65, %66 : vector<1x4xf32>
    %cst_45 = arith.constant 9.99999974E-6 : f32
    %68 = vector.broadcast %cst_45 : f32 to vector<1x4xf32>
    %69 = arith.addf %67, %68 : vector<1x4xf32>
    %70 = math.rsqrt %69 : vector<1x4xf32>
    %c0_46 = arith.constant 0 : index
    %c0_47 = arith.constant 0 : index
    %71 = vector.load %arg5[%c0_46, %c0_47] : memref<4x64xf32, #tpu.memory_space<vmem>>, vector<4x64xf32>
    %cst_48 = arith.constant dense<0.000000e+00> : vector<1x64xf32>
    %72 = tpu.matmul %63, %71, %cst_48 {dimension_numbers = #tpu.dot_dimension_numbers<[1], [0], [0], [1], [0, 0, 1, 1], [], []>} : vector<1x4xf32>, vector<4x64xf32>, vector<1x64xf32> -> vector<1x64xf32>
    %cst_49 = arith.constant dense<0.000000e+00> : vector<1x64xf32>
    %73 = tpu.matmul %70, %71, %cst_49 {dimension_numbers = #tpu.dot_dimension_numbers<[1], [0], [0], [1], [0, 0, 1, 1], [], []>} : vector<1x4xf32>, vector<4x64xf32>, vector<1x64xf32> -> vector<1x64xf32>
    %74 = vector.broadcast %72 : vector<1x64xf32> to vector<16x64xf32>
    %75 = arith.subf %53, %74 : vector<16x64xf32>
    %76 = vector.broadcast %73 : vector<1x64xf32> to vector<16x64xf32>
    %77 = arith.mulf %75, %76 : vector<16x64xf32>
    %c0_50 = arith.constant 0 : index
    %c0_51 = arith.constant 0 : index
    %78 = vector.load %arg6[%c0_50, %c0_51] : memref<64x128xf32, #tpu.memory_space<vmem>>, vector<64x128xf32>
    %cst_52 = arith.constant dense<0.000000e+00> : vector<16x128xf32>
    %79 = tpu.matmul %77, %78, %cst_52 {dimension_numbers = #tpu.dot_dimension_numbers<[1], [0], [0], [1], [0, 0, 1, 1], [], []>} : vector<16x64xf32>, vector<64x128xf32>, vector<16x128xf32> -> vector<16x128xf32>
    %c0_53 = arith.constant 0 : index
    %c0_54 = arith.constant 0 : index
    %80 = vector.load %arg7[%c0_53, %c0_54] : memref<1x128xf32, #tpu.memory_space<vmem>>, vector<1x128xf32>
    %81 = vector.broadcast %80 : vector<1x128xf32> to vector<16x128xf32>
    %82 = arith.addf %79, %81 : vector<16x128xf32>
    %c0_55 = arith.constant 0 : index
    %c0_56 = arith.constant 0 : index
    %c0_57 = arith.constant 0 : index
    %83 = vector.load %arg8[%c0_55, %c0_56, %c0_57] : memref<1x16x128xf32, #tpu.memory_space<vmem>>, vector<1x16x128xf32>
    %84 = vector.shape_cast %83 : vector<1x16x128xf32> to vector<16x128xf32>
    %85 = vector.shape_cast %82 : vector<16x128xf32> to vector<1x16x128xf32>
    tpu.vector_store %arg8[%c0_55, %c0_56, %c0_57], %85 {strides = array<i32>} : memref<1x16x128xf32, #tpu.memory_space<vmem>>, vector<1x16x128xf32>,
    return
  }
  func.func @transform_0(%arg0: i32) -> (i32, i32, i32) {
    %c0_i32 = arith.constant 0 : i32
    %c0_i32_0 = arith.constant 0 : i32
    %c0_i32_1 = arith.constant 0 : i32
    return %arg0, %c0_i32, %c0_i32_0 : i32, i32, i32
  }
  func.func @transform_1(%arg0: i32) -> (i32, i32) {
    %c0_i32 = arith.constant 0 : i32
    %c0_i32_0 = arith.constant 0 : i32
    %c0_i32_1 = arith.constant 0 : i32
    return %c0_i32, %c0_i32_0 : i32, i32
  }
  func.func @transform_2(%arg0: i32) -> (i32, i32) {
    %c0_i32 = arith.constant 0 : i32
    %c0_i32_0 = arith.constant 0 : i32
    %c0_i32_1 = arith.constant 0 : i32
    return %c0_i32, %c0_i32_0 : i32, i32
  }
  func.func @transform_3(%arg0: i32) -> (i32, i32) {
    %c0_i32 = arith.constant 0 : i32
    %c0_i32_0 = arith.constant 0 : i32
    %c0_i32_1 = arith.constant 0 : i32
    return %c0_i32, %c0_i32_0 : i32, i32
  }
  func.func @transform_4(%arg0: i32) -> (i32, i32) {
    %c0_i32 = arith.constant 0 : i32
    %c0_i32_0 = arith.constant 0 : i32
    %c0_i32_1 = arith.constant 0 : i32
    return %c0_i32, %c0_i32_0 : i32, i32
  }
  func.func @transform_5(%arg0: i32) -> (i32, i32) {
    %c0_i32 = arith.constant 0 : i32
    %c0_i32_0 = arith.constant 0 : i32
    %c0_i32_1 = arith.constant 0 : i32
    return %c0_i32, %c0_i32_0 : i32, i32
  }
  func.func @transform_6(%arg0: i32) -> (i32, i32) {
    %c0_i32 = arith.constant 0 : i32
    %c0_i32_0 = arith.constant 0 : i32
    %c0_i32_1 = arith.constant 0 : i32
    return %c0_i32, %c0_i32_0 : i32, i32
  }
  func.func @transform_7(%arg0: i32) -> (i32, i32, i32) {
    %c0_i32 = arith.constant 0 : i32
    %c0_i32_0 = arith.constant 0 : i32
    %c0_i32_1 = arith.constant 0 : i32
    return %arg0, %c0_i32, %c0_i32_0 : i32, i32, i32
  }
}

</mosaic_0001>

<bundles_post_ra>
// kernel: tpu_custom_call.1
= control target key start
LH: loop header
LB: loop body
LE: loop exit
PB: predicated region body
PF: predicated region fallthrough
CT: control target
= control target key end

     0   :  { %s1297_s0 = inlined_call_operand.hbm [shape: f32[2,16,64], index: 0, kind: input, shape index: {}]   ;;  %s1298_s1 = inlined_call_operand.hbm [shape: f32[9,64], index: 1, kind: input, shape index: {}]   ;;  %s1299_s2 = inlined_call_operand.vmem [shape: f32[1,64], index: 2, kind: input, shape index: {}]   ;;  %s1300_s3 = inlined_call_operand.vmem [shape: f32[64,4], index: 3, kind: input, shape index: {}]   ;;  %s1301_s4 = inlined_call_operand.vmem [shape: f32[4,64], index: 4, kind: input, shape index: {}]   ;;  %s1302_s5 = inlined_call_operand.vmem [shape: f32[64,128], index: 5, kind: input, shape index: {}]   ;;  %s1303_s6 = inlined_call_operand.vmem [shape: f32[1,128], index: 6, kind: input, shape index: {}]   ;;  %s1304_s7 = inlined_call_operand.hbm [shape: f32[2,16,128], index: 7, kind: output, shape index: {}]  }
   0x1   :  { %1307 = sst [smem:[#allocation12_spill]] %s1298_s1 }
   0x2   :  { %12 = vsyncpa [#allocation4], 0 }
   0x3   :  { %14 = vsyncpa [#allocation4 + $0x1], 0 }
   0x4   :  { %15 = vsyncpa [#allocation7], 0 }
   0x5   :  { %16 = vsyncpa [#allocation5], 0 }
   0x6   :  { %18 = vsyncpa [#allocation5 + $0x1], 0  ;;  %s1066_s24 = smov 0   ;;  %s1068_s25 = smov 0  }
   0x7   :  { %s1070_s26 = smov 0   ;;  %s1072_s27 = smov 0  }
   0x8 LB: > { %s1087_s28 = sadd.s32 4294967295, %s1014_s27   ;;  %s769_s29 = sadd.s32 4294967294, %s1014_s27   ;;  %s1014_s27 = sphi %s1072_s27, %s1320_s27   ;;  %s1010_s26 = sphi %s1070_s26, %s1319_s26   ;;  %s1006_s25 = sphi %s1068_s25, %s1318_s25   ;;  %s1002_s24 = sphi %s1066_s24, %s1317_s24  }
   0x9   : > { %p44_p0 = scmp.ne.s32.totalorder %s1006_s25, %s1002_s24  ;;  %p45_p1 = scmp.eq.s32.totalorder %s1087_s28, 0 }
   0xa   : > { %p194_p2 = scmp.eq.s32.totalorder %s1087_s28, 1  ;;  %p200_p3 = scmp.eq.s32.totalorder %s769_s29, 1 }
   0xb   : > { %p1096_p4 = por %p45_p1, %p44_p0  ;;  %p770_p5 = scmp.ge.s32.totalorder %s1014_s27, 1 }
   0xc   : > { %p1101_p6 = por %p200_p3, %p44_p0  ;;  %p207_p7 = scmp.lt.s32.totalorder %s1014_s27, 3 }
   0xd   : > { %s1310_s1 = sld [smem:[#allocation12_spill]]  ;;  %s1016_s13 = smov [#allocation6]  }
   0xe   : > { %p1109_p8 = pnand %p770_p5, %p207_p7  ;;  %s220_s14 = sshll.u32 %s1016_s13, 4  ;;  %s221_s14 = int_to_ptr.vmem [resolvable:$true] %s220_s14 }
   0xf   : > { %s1119_s15 = sadd.s32 1, %s1014_s27   ;;  %s1305_s16 = smov 128  }
  0x10   : > { %p811_p9 = pneg %p1109_p8  ;;  %s1306_s17 = smov 8  }
  0x11   : > { %s28_s18 = ssub.s32 %s1014_s27, %s1119_s15  ;;  %s31_s19 = sadd.s32 1, %s1010_s26 }
  0x12   : > { %p812_p10 = pnand %p811_p9, %p45_p1  ;;  %p29_p12 = scmp.eq.s32.totalorder %s28_s18, 0 }
  0x13   : > { %s218_s11 = sshll.u32 %s1310_s1, 4  ;;  %p38_p13 = scmp.ne.s32.totalorder %s1010_s26, %s1006_s25  ;;  %s219_s11 = int_to_ptr.hbm [resolvable:$true] %s218_s11 }
  0x14   : > { %814 = dma.hbm_to_vmem [thread:$0]  (!%p812_p10), %s219_s11, 256, %s221_s14, [#allocation7], %s1305_s16, %s1305_s16, %s1306_s17  }
  0x15   : > { %p39_p0 = scmp.eq.s32.totalorder %s1014_s27, 0  ;;  %p1135_p3 = por %p194_p2, %p38_p13 }
  0x16   : > { %s1131_s20 = scalar_select %p29_p12, %s1010_s26, %s31_s19  }
  0x17   : > { %p824_p5 = scmp.lt.s32.totalorder %s1014_s27, 2  ;;  %s249_s22 = sand.u32 1, %s1010_s26  }
  0x18   : > { %s793_s23 = sshll.u32 %s1014_s27, 4  ;;  %p40_p7 = por %p39_p0, %p38_p13 }
  0x19   : > { %s773_s29 = sshll.u32 %s249_s22, 4  ;;  %s258_s11 = scalar_lea.hbm %s1297_s0, %s793_s23 }
  0x1a   : > { %s259_s13 = sshll.u32 %s258_s11, 4  ;;  %s253_s14 = scalar_lea.vmem [#allocation3], %s773_s29  ;;  %s260_s13 = int_to_ptr.hbm [resolvable:$true] %s259_s13 }
  0x1b   : > { %s261_s18 = sshll.u32 %s253_s14, 4  ;;  %p1145_p9 = pnand %p824_p5, %p40_p7  ;;  %s262_s18 = int_to_ptr.vmem [resolvable:$true] %s261_s18 }
  0x1c   : > { %s250_s16 = scalar_lea.sflag [#allocation4], %s249_s22  ;;  %s914_s17 = sshra.s32 %s260_s13, 4  ;;  %s915_s17 = int_to_ptr.hbm [resolvable:$true] %s914_s17 }
  0x1d   : > { %s916_s1 = scalar_lea.hbm %s915_s17, 16  ;;  %p918_p10 = pneg %p1145_p9 }
  0x1e   : > { %p917_p2 = scmp.ne.s32.totalorder %s915_s17, %s916_s1  ;;  %s921_s29 = scalar_lea.hbm %s1297_s0, 32 }
  0x1f   : > { %p922_p0 = scmp.lt.s32.totalorder %s915_s17, %s1297_s0  ;;  %p923_p5 = scmp.lt.s32.totalorder %s921_s29, %s916_s1 }
  0x20   : > { %p919_p12 = pnand %p918_p10, %p917_p2 }
  0x21   : > { %p924_p7 = por %p923_p5, %p922_p0 }
  0x22   : > { %p920_p13 = pneg %p919_p12 }
  0x24   : > { %p925_p11 = pnand %p924_p7, %p920_p13 }
  0x26   : > { %928 = shalt.err (!%p925_p11)
}
  0x27   : > { %s1314_s22 = smov 8   ;;  %s1315_s14 = smov 128  }
  0x28   : > { %818 = dma.hbm_to_vmem [thread:$0]  (!%p1145_p9), %s260_s13, 256, %s262_s18, %s250_s16, %s1315_s14, %s1315_s14, %s1314_s22  }
  0x29   : > { %273 = sbr.rel (%p1109_p8) target bundleno = 768 (0x300), region = 48  ;;  %s1165_s23 = sand.u32 (!%p1109_p8), 1, %s1006_s25  }
  0x2a   : > { %s777_s1 = sshll.u32 (!%p1109_p8), %s1165_s23, 4  ;;  %s276_s17 = scalar_lea.sflag (!%p1109_p8), [#allocation4], %s1165_s23 }
  0x2b   : > { %s279_s9 = scalar_lea.vmem (!%p1109_p8), [#allocation3], %s777_s1 }
  0x2e   : > { %989 = dma.done.wait (%p1096_p4), %s276_s17, 256  }
  0x2f   : > { %991 = vsyncadd (%p1096_p4), %s276_s17, 4294967040 }
  0x30   : > { %993 = dma.done.wait (%p45_p1), [#allocation7], 256  }
  0x31   : > { %995 = vsyncadd (%p45_p1), [#allocation7], 4294967040  ;;  %v321_v0 = vld [vmem:[%s279_s9] sm:$0xff]  ;;  %s1019_s12 = smov 4   ;;  %v322_v3 = vld [vmem:[%s279_s9 + $0x8] sm:$0xff]  ;;  %s1020_s16 = smov 8  }
  0x32   : > { %v869_v1 = vld [vmem:[#allocation6 + $0x1] ss:$0 sm:$0xff]  ;;  %325 = vrot.lane.b32.xlu0 %v321_v0, %s1019_s12  ;;  %v873_v2 = vld [vmem:[#allocation6 + $0x4] ss:$0 sm:$0xff]  ;;  %v870_v4 = vld [vmem:[#allocation6 + $0x2] ss:$0 sm:$0xff] }
  0x33   : > { %345 = vrot.lane.b32.xlu1 %v869_v1, %s1019_s12  ;;  %389 = vrot.lane.b32.xlu2 %v873_v2, %s1019_s12  ;;  %v874_v5 = vld [vmem:[#allocation6 + $0x5] ss:$0 sm:$0xff]  ;;  %v871_v6 = vld [vmem:[#allocation6 + $0x7] ss:$0 sm:$0xff]  ;;  %v872_v7 = vld [vmem:[#allocation6 + $0x8] ss:$0 sm:$0xff] }
  0x34   : > { %vm316_vm0 = vcmask 588800   ;;  %v1021_v8 = vmov 0.0   ;;  %vm319_vm1 = vcmask 582656   ;;  %vm331_vm2 = vcmask 556064   ;;  %s1022_s30 = smov 124   ;;  %s1023_s13 = smov 120  }
  0x35   : > { %317 = vst.msk [vmem:[#allocation2] sm:$0xff] %vm316_vm0, %v1021_v8  ;;  %v875_v35 = vld [vmem:[#allocation6] ss:$0 sm:$0xff]  ;;  %v876_v38 = vld [vmem:[#allocation6 + $0x3] ss:$0 sm:$0xff]  ;;  %v478_v46 = vld [vmem:[%s1300_s3 + $0x30] sm:$0xff] }
  0x36   : > { %318 = vst.msk [vmem:[#allocation2 + $0x8] sm:$0xff] %vm316_vm0, %v1021_v8  ;;  %v479_v45 = vld [vmem:[%s1300_s3 + $0x38] sm:$0xff]  ;;  %v477_v50 = vld [vmem:[%s1300_s3 + $0x28] sm:$0xff]  ;;  %v476_v54 = vld [vmem:[%s1300_s3 + $0x20] sm:$0xff]  ;;  %vm480_vm3 = vcmask 523264   ;;  %vm574_vm4 = vcmask 1043456  }
  0x37   : > { %320 = vst.msk [vmem:[#allocation2 + $0x10] sm:$0x3] %vm319_vm1, %v1021_v8  ;;  %512 = vmatpush.msra.mxu0 %v479_v45  ;;  %535 = vmatpush.msra.mxu1 %v479_v45  ;;  %v475_v56 = vld [vmem:[%s1300_s3 + $0x18] sm:$0xff]  ;;  %v474_v58 = vld [vmem:[%s1300_s3 + $0x10] sm:$0xff]  ;;  %v473_v61 = vld [vmem:[%s1300_s3 + $0x8] sm:$0xff]  ;;  %vm570_vm6 = vcmask 31744  }
  0x38   : > { %v877_v57 = vld [vmem:[#allocation6 + $0x6] ss:$0 sm:$0xff]  ;;  %v472_v1 = vld [vmem:[%s1300_s3] sm:$0xff]  ;;  %s794_s18 = sshll.u32 %s1087_s28, 4  ;;  %s315_s14 = scalar_lea.vmem [#allocation8], %s777_s1 }
  0x39   : > { %513 = vmatpush.msra.mxu0 %v478_v46  ;;  %536 = vmatpush.msra.mxu1 %v478_v46  ;;  %s682_s10 = scalar_lea.hbm %s1304_s7, %s794_s18  ;;  %s683_s17 = sshll.u32 %s315_s14, 4  ;;  %s684_s17 = int_to_ptr.vmem [resolvable:$true] %s683_s17 }
  0x3a   : > { %327 = vrot.lane.b32.xlu0 %v322_v3, %s1019_s12  ;;  %s685_s9 = sshll.u32 %s682_s10, 4  ;;  %s671_s28 = scalar_lea.sflag [#allocation5], %s1165_s23  ;;  %s686_s9 = int_to_ptr.hbm [resolvable:$true] %s685_s9 }
  0x3b   : > { %363 = vrot.lane.b32.xlu1 %v870_v4, %s1020_s16  ;;  %407 = vrot.lane.b32.xlu2 %v874_v5, %s1020_s16  ;;  %s964_s18 = scalar_lea.hbm %s1304_s7, 32 }
  0x3c   : > { %514 = vmatpush.msra.mxu0 %v477_v50  ;;  %537 = vmatpush.msra.mxu1 %v477_v50 }
  0x3e   : > { %515 = vmatpush.msra.mxu0 %v476_v54  ;;  %538 = vmatpush.msra.mxu1 %v476_v54 }
  0x40   : > { %516 = vmatpush.msra.mxu0 %v475_v56  ;;  %539 = vmatpush.msra.mxu1 %v475_v56 }
  0x42   : > { %433 = vrot.lane.b32.xlu0 %v871_v6, %s1019_s12  ;;  %517 = vmatpush.msra.mxu0 %v474_v58  ;;  %s958_s12 = sshra.s32 %s686_s9, 4  ;;  %s959_s12 = int_to_ptr.hbm [resolvable:$true] %s958_s12 }
  0x43   : > { %451 = vrot.lane.b32.xlu1 %v872_v7, %s1020_s16  ;;  %540 = vmatpush.msra.mxu1 %v474_v58  ;;  %p965_p11 = scmp.lt.s32.totalorder %s959_s12, %s1304_s7 }
  0x44   : > { %518 = vmatpush.msra.mxu0 %v473_v61 }
  0x45   : > { %541 = vmatpush.msra.mxu1 %v473_v61  ;;  %v634_v61 = vld [vmem:[%s1302_s5 + $0x38] sm:$0xff] }
  0x46   : > { %519 = vmatpush.msra.mxu0 %v472_v1 }
  0x47   : > { %542 = vmatpush.msra.mxu1 %v472_v1  ;;  %v630_v1 = vld [vmem:[%s1302_s5 + $0x18] sm:$0xff] }
  0x8d   : > { %v390_v16 = vpop.permute.xlu2 %389 }
  0x95   : > { %v408_v22 = vpop.permute.xlu2 %407 }
  0xa4   : > { %v326_v9 = vpop.permute.xlu0 %325 }
  0xa5   : > { %332 = vst.msk [vmem:[#allocation2 + $0x1] sm:$0xff] %vm331_vm2, %v326_v9  ;;  %v346_v10 = vpop.permute.xlu1 %345 }
  0xac   : > { %v334_v11 = vld [vmem:[#allocation2] sm:$0xff]  ;;  %v328_v12 = vpop.permute.xlu0 %327 }
  0xad   : > { %v348_v13 = vmul.f32 %v346_v10, %v334_v11  ;;  %333 = vst.msk [vmem:[#allocation2 + $0x9] sm:$0xff] %vm331_vm2, %v328_v12  ;;  %v364_v14 = vpop.permute.xlu1 %363  ;;  %v378_v23 = vld [vmem:[#allocation2 + $0x1] sm:$0xff]  ;;  %v338_v37 = vmul.f32 %v875_v35, %v334_v11 }
  0xae   : > { %v366_v15 = vmul.f32 %v364_v14, %v334_v11  ;;  %v410_v26 = vmul.f32 %v408_v22, %v378_v23  ;;  %v392_v27 = vmul.f32 %v390_v16, %v378_v23  ;;  %v382_v42 = vmul.f32 %v876_v38, %v378_v23 }
  0xaf   : > { %352 = vrot.lane.b32.xlu2 %v348_v13, %s1022_s30 }
  0xb0   : > { %370 = vrot.lane.b32.xlu1 %v366_v15, %s1023_s13 }
  0xb4   : > { %v335_v17 = vld [vmem:[#allocation2 + $0x8] sm:$0xff]  ;;  %v434_v24 = vpop.permute.xlu0 %433 }
  0xb5   : > { %v367_v18 = vmul.f32 %v364_v14, %v335_v17  ;;  %v349_v19 = vmul.f32 %v346_v10, %v335_v17  ;;  %v379_v20 = vld [vmem:[#allocation2 + $0x9] sm:$0xff]  ;;  %v452_v30 = vpop.permute.xlu1 %451  ;;  %v339_v44 = vmul.f32 %v875_v35, %v335_v17  ;;  %v878_v10 = vld [vmem:[%s1299_s2] ss:$0 sm:$0xff] }
  0xb6   : > { %v393_v21 = vmul.f32 %v390_v16, %v379_v20  ;;  %v422_v25 = vld [vmem:[#allocation2 + $0x2] sm:$0xff]  ;;  %v423_v29 = vld [vmem:[#allocation2 + $0xa] sm:$0xff]  ;;  %v411_v32 = vmul.f32 %v408_v22, %v379_v20  ;;  %v383_v53 = vmul.f32 %v876_v38, %v379_v20 }
  0xb7   : > { %354 = vrot.lane.b32.xlu0 %v349_v19, %s1022_s30  ;;  %372 = vrot.lane.b32.xlu2 %v367_v18, %s1023_s13  ;;  %v436_v28 = vmul.f32 %v434_v24, %v422_v25  ;;  %v437_v31 = vmul.f32 %v434_v24, %v423_v29  ;;  %v455_v33 = vmul.f32 %v452_v30, %v423_v29 }
  0xb8   : > { %398 = vrot.lane.b32.xlu1 %v393_v21, %s1022_s30  ;;  %v454_v34 = vmul.f32 %v452_v30, %v422_v25  ;;  %v426_v0 = vmul.f32 %v877_v57, %v422_v25  ;;  %v427_v6 = vmul.f32 %v877_v57, %v423_v29 }
  0xbf   : > { %396 = vrot.lane.b32.xlu0 %v392_v27, %s1022_s30  ;;  %414 = vrot.lane.b32.xlu2 %v410_v26, %s1023_s13 }
  0xc0   : > { %440 = vrot.lane.b32.xlu1 %v436_v28, %s1022_s30 }
  0xc7   : > { %416 = vrot.lane.b32.xlu0 %v411_v32, %s1023_s13  ;;  %442 = vrot.lane.b32.xlu2 %v437_v31, %s1022_s30  ;;  %s960_s30 = scalar_lea.hbm %s959_s12, 16 }
  0xc8   : > { %460 = vrot.lane.b32.xlu1 %v455_v33, %s1023_s13  ;;  %p961_p1 = scmp.ne.s32.totalorder %s959_s12, %s960_s30  ;;  %p966_p9 = scmp.lt.s32.totalorder %s964_s18, %s960_s30 }
  0xca   : > { %p962_p4 = pnand %p961_p1, %p1135_p3  ;;  %p967_p2 = por %p966_p9, %p965_p11 }
  0xcc   : > { %p963_p8 = pneg %p962_p4 }
  0xce   : > { %p968_p10 = pnand %p967_p2, %p963_p8 }
  0xcf   : > { %458 = vrot.lane.b32.xlu0 %v454_v34, %s1023_s13 }
 0x109   : > { %v353_v36 = vpop.permute.xlu2 %352 }
 0x10a   : > { %v358_v39 = vadd.f32 %v353_v36, %v338_v37 }
 0x111   : > { %v373_v47 = vpop.permute.xlu2 %372 }
 0x119   : > { %v415_v62 = vpop.permute.xlu2 %414 }
 0x121   : > { %v443_v9 = vpop.permute.xlu2 %442 }
 0x122   : > { %v371_v40 = vpop.permute.xlu1 %370 }
 0x123   : > { %v376_v41 = vadd.f32 %v371_v40, %v358_v39  ;;  %v569_v39 = vld [vmem:[%s1301_s4] sm:$0xf]  ;;  %v1024_v40 = vmov 256.0  }
 0x124   : > { %880 = vrcp.f32 %v1024_v40  ;;  %782 = vmatpush.msk.msra.mxu2 %vm574_vm4, %v569_v39  ;;  %784 = vmatpush.msk.msra.mxu3 %vm574_vm4, %v569_v39 }
 0x125   : > { %v384_v43 = vadd.f32 %v382_v42, %v376_v41 }
 0x126   : > { %653 = vmatpush.msrb.mxu2 %v634_v61  ;;  %795 = vmatpush.msrb.mxu3 %v634_v61 }
 0x129   : > { %v355_v48 = vpop.permute.xlu0 %354 }
 0x12a   : > { %v359_v49 = vadd.f32 %v355_v48, %v339_v44  ;;  %v399_v51 = vpop.permute.xlu1 %398  ;;  %v881_v41 = vpop.eup %880 }
 0x12b   : > { %v548_v42 = vmul.f32 256.0, %v881_v41  ;;  %vm552_vm5 = vweird.f32 %v881_v41 }
 0x12c   : > { %v377_v52 = vadd.f32 %v373_v47, %v359_v49 }
 0x12e   : > { %v385_v55 = vadd.f32 %v383_v53, %v377_v52 }
 0x130   : > { %v403_v4 = vadd.f32 %v399_v51, %v385_v55 }
 0x131   : > { %v397_v59 = vpop.permute.xlu0 %396 }
 0x132   : > { %v402_v60 = vadd.f32 %v397_v59, %v384_v43  ;;  %v441_v2 = vpop.permute.xlu1 %440  ;;  %v549_v43 = vsub.f32 1.0, %v548_v42 }
 0x134   : > { %v420_v63 = vadd.f32 %v415_v62, %v402_v60  ;;  %v550_v44 = vmul.f32 %v881_v41, %v549_v43  ;;  %v633_v62 = vld [vmem:[%s1302_s5 + $0x30] sm:$0xff] }
 0x135   : > { %654 = vmatpush.msrb.mxu2 %v633_v62  ;;  %796 = vmatpush.msrb.mxu3 %v633_v62 }
 0x136   : > { %v428_v3 = vadd.f32 %v426_v0, %v420_v63  ;;  %v551_v45 = vadd.f32 %v881_v41, %v550_v44  ;;  %v632_v63 = vld [vmem:[%s1302_s5 + $0x28] sm:$0xff]  ;;  %v631_v0 = vld [vmem:[%s1302_s5 + $0x20] sm:$0xff] }
 0x137   : > { %655 = vmatpush.msrb.mxu2 %v632_v63  ;;  %797 = vmatpush.msrb.mxu3 %v632_v63 }
 0x138   : > { %v446_v13 = vadd.f32 %v441_v2, %v428_v3  ;;  %v553_v46 = vsel %vm552_vm5, %v881_v41, %v551_v45  ;;  %v629_v2 = vld [vmem:[%s1302_s5 + $0x10] sm:$0xff]  ;;  %v628_v3 = vld [vmem:[%s1302_s5 + $0x8] sm:$0xff] }
 0x139   : > { %v417_v5 = vpop.permute.xlu0 %416  ;;  %656 = vmatpush.msrb.mxu2 %v631_v0  ;;  %798 = vmatpush.msrb.mxu3 %v631_v0 }
 0x13a   : > { %v421_v7 = vadd.f32 %v417_v5, %v403_v4  ;;  %v461_v12 = vpop.permute.xlu1 %460  ;;  %v627_v4 = vld [vmem:[%s1302_s5] sm:$0xff] }
 0x13b   : > { %657 = vmatpush.msrb.mxu2 %v630_v1  ;;  %799 = vmatpush.msrb.mxu3 %v630_v1 }
 0x13c   : > { %v429_v8 = vadd.f32 %v427_v6, %v421_v7 }
 0x13d   : > { %658 = vmatpush.msrb.mxu2 %v629_v2  ;;  %800 = vmatpush.msrb.mxu3 %v629_v2 }
 0x13e   : > { %v447_v11 = vadd.f32 %v443_v9, %v429_v8 }
 0x13f   : > { %659 = vmatpush.msrb.mxu2 %v628_v3  ;;  %801 = vmatpush.msrb.mxu3 %v628_v3 }
 0x140   : > { %v465_v14 = vadd.f32 %v461_v12, %v447_v11 }
 0x141   : > { %v459_v15 = vpop.permute.xlu0 %458  ;;  %660 = vmatpush.msrb.mxu2 %v627_v4  ;;  %802 = vmatpush.msrb.mxu3 %v627_v4 }
 0x142   : > { %v1209_v16 = vadd.f32 %v878_v10, %v465_v14  ;;  %v464_v17 = vadd.f32 %v459_v15, %v446_v13  ;;  %v879_v13 = vld [vmem:[%s1303_s6] ss:$0 sm:$0xff] }
 0x144   : > { %v491_v18 = vmul.f32 %v1209_v16, %v1209_v16  ;;  %v1213_v19 = vadd.f32 %v878_v10, %v464_v17  ;;  %v482_v20 = vsel %vm480_vm3, %v1209_v16, 0.0 }
 0x146   : > { %v481_v21 = vsel %vm480_vm3, %v1213_v19, 0.0  ;;  %v490_v22 = vmul.f32 %v1213_v19, %v1213_v19  ;;  %v493_v24 = vsel %vm480_vm3, %v491_v18, 0.0 }
 0x147   : > { %v483_v23 = vadd.f32 %v482_v20, %v481_v21 }
 0x148   : > { %v492_v25 = vsel %vm480_vm3, %v490_v22, 0.0 }
 0x149   : > { %v484_v26 = vrot.slane %v483_v23, 4  ;;  %v494_v27 = vadd.f32 %v493_v24, %v492_v25 }
 0x14b   : > { %v485_v28 = vadd.f32 %v484_v26, %v483_v23  ;;  %v495_v29 = vrot.slane %v494_v27, 4 }
 0x14d   : > { %v486_v30 = vrot.slane %v485_v28, 2  ;;  %v496_v31 = vadd.f32 %v495_v29, %v494_v27 }
 0x14f   : > { %v487_v32 = vadd.f32 %v486_v30, %v485_v28  ;;  %v497_v33 = vrot.slane %v496_v31, 2 }
 0x151   : > { %v488_v34 = vrot.slane %v487_v32, 1  ;;  %v498_v35 = vadd.f32 %v497_v33, %v496_v31 }
 0x153   : > { %v489_v36 = vadd.f32 %v488_v34, %v487_v32  ;;  %v499_v37 = vrot.slane %v498_v35, 1 }
 0x155   : > { %780 = vmatmul.msk.f32.vlgmr.msra.gmra.mxu0 %vm480_vm3, %v489_v36  ;;  %v500_v38 = vadd.f32 %v499_v37, %v498_v35 }
 0x157   : > { %781 = vmatmul.msk.f32.vlgmr.msra.gmra.mxu1 %vm480_vm3, %v500_v38 }
 0x1d2   : > { %v521_v47 = vpop.f32.mrf.mxu0 }
 0x1d3   : > { %v554_v48 = vmul.f32 %v553_v46, %v521_v47 }
 0x1d4   : > { %v544_v49 = vpop.f32.mrf.mxu1 }
 0x1d5   : > { %v556_v50 = vmul.f32 %v554_v48, %v554_v48  ;;  %v555_v51 = vmul.f32 %v553_v46, %v544_v49  ;;  %783 = vmatmul.msk.f32.vlgmr.msra.gmra.mxu2 %vm570_vm6, %v554_v48 }
 0x1d7   : > { %v557_v52 = vsub.f32 %v555_v51, %v556_v50 }
 0x1d9   : > { %v558_v53 = vadd.f32 1e-05, %v557_v52 }
 0x1db   : > { %882 = vrsqrt.f32 %v558_v53  ;;  %vm565_vm8 = vweird.f32 %v558_v53 }
 0x1e1   : > { %v883_v54 = vpop.eup %882 }
 0x1e2   : > { %v560_v55 = vmul.f32 %v883_v54, %v558_v53  ;;  %vm566_vm7 = vweird.f32 %v883_v54 }
 0x1e3   : > { %vm567_vm9 = vmor %vm565_vm8, %vm566_vm7 }
 0x1e4   : > { %v561_v56 = vmul.f32 %v883_v54, %v560_v55 }
 0x1e6   : > { %v562_v57 = vmul.f32 0.5, %v561_v56 }
 0x1e8   : > { %v563_v58 = vsub.f32 1.5, %v562_v57 }
 0x1ea   : > { %v564_v59 = vmul.f32 %v883_v54, %v563_v58 }
 0x1ec   : > { %v568_v60 = vsel %vm567_vm9, %v883_v54, %v564_v59 }
 0x1ed   : > { %785 = vmatmul.msk.f32.vlgmr.msra.gmra.mxu3 %vm570_vm6, %v568_v60 }
 0x258   : > { %v595_v5 = vpop.f32.mrf.mxu2 }
 0x259   : > { %v621_v6 = vperm.slane %v595_v5, 0 }
 0x25b   : > { %v622_v8 = vsub.f32 %v1213_v19, %v621_v6  ;;  %v623_v9 = vsub.f32 %v1209_v16, %v621_v6 }
 0x270   : > { %v618_v7 = vpop.f32.mrf.mxu3 }
 0x271   : > { %v624_v10 = vperm.slane %v618_v7, 0 }
 0x273   : > { %v625_v11 = vmul.f32 %v624_v10, %v622_v8  ;;  %v626_v12 = vmul.f32 %v624_v10, %v623_v9 }
 0x275   : > { %786 = vmatmul.msk.f32.vlgmr.msrb.gmra.mxu2 %vm480_vm3, %v625_v11  ;;  %787 = vmatmul.msk.f32.vlgmr.msrb.gmra.mxu3 %vm480_vm3, %v626_v12 }
 0x2f8   : > { %v662_v14 = vpop.f32.mrf.mxu2  ;;  %v665_v15 = vpop.f32.mrf.mxu3 }
 0x2f9   : > { %v663_v16 = vadd.f32 %v879_v13, %v662_v14  ;;  %v666_v17 = vadd.f32 %v879_v13, %v665_v15 }
 0x2fb   : > { %668 = vst [vmem:[%s315_s14] sm:$0xff] %v663_v16 }
 0x2fc   : > { %669 = vst [vmem:[%s315_s14 + $0x8] sm:$0xff] %v666_v17 }
 0x2fd   : > { %971 = shalt.err (!%p968_p10)
}
 0x2fe   : > { %s1025_s23 = smov 128  }
 0x2ff   : > { %809 = dma.vmem_to_hbm [thread:$0]  (%p1135_p3), %s684_s17, 256, %s686_s9, %s671_s28, %s1025_s23, %s1025_s23, %s1020_s16  }
 0x300 PF: > { %s700_s10 = sand.u32 1, %s1002_s24   ;;  %p1316_p12 = scmp.ge.s32.totalorder %s1014_s27, 2 }
 0x301   : > { %s701_s11 = scalar_lea.sflag [#allocation5], %s700_s10 }
 0x302   : > { %p820_p13 = pnand %p1316_p12, %p1101_p6 }
 0x304   : > { %p821_p0 = pneg %p820_p13 }
 0x306   : > { %997 = dma.done.wait (%p821_p0), %s701_s11, 256  }
 0x307   : > { %999 = vsyncadd (%p821_p0), %s701_s11, 4294967040  ;;  %p21_p5 = scmp.ge.s32.totalorder %s1119_s15, 4   ;;  %s1317_s24 = smov %s1006_s25 }
 0x308   : > { %s1318_s25 = smov %s1010_s26  ;;  %s1319_s26 = smov %s1131_s20 }
 0x309   : > { %s1320_s27 = smov %s1119_s15  ;;  %23 = sbr.rel (!%p21_p5) target bundleno = 8 (0x8), region = 97 }
 0x30e   :  { %707 = vsyncpa [#allocation4], 1 }
 0x30f   :  { %709 = vsyncpa [#allocation4 + $0x1], 1 }
 0x310   :  { %710 = vsyncpa [#allocation7], 1 }
 0x311   :  { %711 = vsyncpa [#allocation5], 1 }
 0x312   :  { %713 = vsyncpa [#allocation5 + $0x1], 1 }

</bundles_post_ra>
